<compile_context>
chip_gen: v5e
topology: v5e:2x2
jax: 0.10.0
libtpu: 0.0.40
codegen_flags: <defaults>
</compile_context>

<pallas_src>
import functools

import jax
import jax.numpy as jnp
from jax.experimental import pallas as pl
from jax.experimental.pallas import tpu as pltpu

HIDDEN = 256
LANE = 128


def _actor_kernel(x_ref, w1_ref, b1_ref, w2_ref, b2_ref, w3_ref, b3_ref, o_ref,
                  *, max_action):
    # Cast activations to the weight dtype so the MXU runs its native (bf16) path
    # when weights are bf16; accumulation is always f32. Bias add / ReLU / tanh
    # stay in f32 (v5e VPU/EUP have no bf16 ALUs).
    x = x_ref[...].astype(w1_ref.dtype)                                   # (TM, S)

    # Layer 1: Linear(state_dim, 256) + ReLU   (K=state_dim is tiny; Mosaic pads it)
    h1 = jnp.dot(x, w1_ref[...], preferred_element_type=jnp.float32)
    h1 = jnp.maximum(h1 + b1_ref[...].astype(jnp.float32), 0.0)

    # Layer 2: Linear(256, 256) + ReLU
    h2 = jnp.dot(h1.astype(w2_ref.dtype), w2_ref[...],
                 preferred_element_type=jnp.float32)
    h2 = jnp.maximum(h2 + b2_ref[...].astype(jnp.float32), 0.0)

    # Layer 3: Linear(256, action_dim_padded) + Tanh, scaled by max_action.
    # Output columns are zero-padded to a multiple of 128 -> unmasked lane-dense
    # stores; the extra columns are sliced off in the wrapper.
    y = jnp.dot(h2.astype(w3_ref.dtype), w3_ref[...],
                preferred_element_type=jnp.float32)
    y = y + b3_ref[...].astype(jnp.float32)
    o_ref[...] = (max_action * jnp.tanh(y)).astype(o_ref.dtype)


def _cdiv(a, b):
    return (a + b - 1) // b


def _round_up(x, m):
    return _cdiv(x, m) * m


def actor_forward(state, params, max_action, *, tm_max=2048, min_steps=1):
    """state: (B, state_dim) f32. params: dict of (in,out) weights + (1,out) f32 biases.

    tm_max: upper bound on rows per grid step. The kernel is per-step-overhead
      bound, so the grid is made as small as possible (one step for B <= tm_max).
    min_steps: set to 2 on v7x for large batches so the "parallel" batch axis
      shards across both TensorCores (weights are replicated per-core, <0.3 MiB).
    """
    B, state_dim = state.shape
    hidden = params["w1"].shape[1]
    action_dim = params["w3"].shape[1]
    wdtype = params["w1"].dtype

    # Sublane alignment: bf16 packs 16 rows per vreg, f32 packs 8.
    align = 16 if wdtype == jnp.bfloat16 else 8

    # Grid-step count: as few as possible; never more steps than useful batch rows.
    n_steps = max(1, _cdiv(B, tm_max))
    n_steps = max(n_steps, min(min_steps, _cdiv(B, align)))
    tm = _round_up(_cdiv(B, n_steps), align)
    b_pad = n_steps * tm
    if b_pad != B:
        state = jnp.pad(state, ((0, b_pad - B), (0, 0)))

    # Lane-dense output: pad layer-3 output columns to a multiple of 128.
    a_pad = _round_up(action_dim, LANE)
    w3, b3 = params["w3"], params["b3"]
    if a_pad != action_dim:
        w3 = jnp.pad(w3, ((0, 0), (0, a_pad - action_dim)))
        b3 = jnp.pad(b3, ((0, 0), (0, a_pad - action_dim)))

    # Weights/biases: full-array blocks with constant index_maps -> DMA'd to VMEM
    # once, resident across the batch grid (no per-step re-DMA).
    in_specs = [
        pl.BlockSpec((tm, state_dim), lambda i: (i, 0)),   # streamed state tile
        pl.BlockSpec(params["w1"].shape, lambda i: (0, 0)),
        pl.BlockSpec(params["b1"].shape, lambda i: (0, 0)),
        pl.BlockSpec(params["w2"].shape, lambda i: (0, 0)),
        pl.BlockSpec(params["b2"].shape, lambda i: (0, 0)),
        pl.BlockSpec(w3.shape, lambda i: (0, 0)),
        pl.BlockSpec(b3.shape, lambda i: (0, 0)),
    ]
    out_spec = pl.BlockSpec((tm, a_pad), lambda i: (i, 0))

    flops = 2 * b_pad * (state_dim * hidden + hidden * hidden + hidden * a_pad)
    bytes_params = sum(int(v.size) * v.dtype.itemsize
                       for v in (params["w1"], params["b1"], params["w2"],
                                 params["b2"], w3, b3))
    bytes_io = int(state.size) * state.dtype.itemsize + b_pad * a_pad * 4
    cost = pl.CostEstimate(flops=flops,
                           transcendentals=b_pad * a_pad,
                           bytes_accessed=bytes_params + bytes_io)

    out = pl.pallas_call(
        functools.partial(_actor_kernel, max_action=float(max_action)),
        out_shape=jax.ShapeDtypeStruct((b_pad, a_pad), jnp.float32),
        grid=(n_steps,),
        in_specs=in_specs,
        out_specs=out_spec,
        compiler_params=pltpu.CompilerParams(
            dimension_semantics=("parallel",)),   # shards batch grid over v7x's 2 TCs
        cost_estimate=cost,
    )(
        state,
        params["w1"], params["b1"],
        params["w2"], params["b2"],
        w3, b3,
    )
    return out[:B, :action_dim]


def init_actor_params(key, state_dim, action_dim, hidden=HIDDEN,
                      weight_dtype=jnp.bfloat16):
    """Deterministic synthetic init (uniform fan-in scaling, like PyTorch default).

    Weights stored as (in, out) = nn.Linear weight transposed; biases (1, out) f32.
    weight_dtype defaults to bf16 (halves weight HBM traffic on all generations;
    the kernel always accumulates in f32). Pass float32 for exact-reference checks.
    """
    ks = jax.random.split(key, 6)

    def lin(kw, kb, fan_in, fan_out):
        bound = 1.0 / jnp.sqrt(jnp.float32(fan_in))
        w = jax.random.uniform(kw, (fan_in, fan_out), jnp.float32, -bound, bound)
        b = jax.random.uniform(kb, (1, fan_out), jnp.float32, -bound, bound)
        return w.astype(weight_dtype), b   # biases kept f32

    w1, b1 = lin(ks[0], ks[1], state_dim, hidden)
    w2, b2 = lin(ks[2], ks[3], hidden, hidden)
    w3, b3 = lin(ks[4], ks[5], hidden, action_dim)
    return {"w1": w1, "b1": b1, "w2": w2, "b2": b2, "w3": w3, "b3": b3}


def actor_reference(state, params, max_action):
    """Pure-JAX f32 reference matching the PyTorch module."""
    w1 = params["w1"].astype(jnp.float32)
    w2 = params["w2"].astype(jnp.float32)
    w3 = params["w3"].astype(jnp.float32)
    h = jnp.maximum(state @ w1 + params["b1"], 0.0)
    h = jnp.maximum(h @ w2 + params["b2"], 0.0)
    return max_action * jnp.tanh(h @ w3 + params["b3"])


if __name__ == "__main__":
    key = jax.random.PRNGKey(0)
    k_params, k_state, k_big = jax.random.split(key, 3)

    state_dim = 8
    action_dim = 4
    max_action = 2.0

    # --- f32 path, small batch (spec shape: B=2), single grid step -------------
    params_f32 = init_actor_params(k_params, state_dim, action_dim,
                                   weight_dtype=jnp.float32)
    state_small = jax.random.normal(k_state, (2, state_dim), jnp.float32)

    out_small = jax.block_until_ready(actor_forward(state_small, params_f32, max_action))
    ref_small = actor_reference(state_small, params_f32, max_action)
    assert out_small.shape == (2, action_dim)
    assert jnp.all(jnp.isfinite(out_small))
    assert jnp.allclose(out_small, ref_small, atol=1e-5, rtol=1e-5)

    # --- f32 path, B=300: default tiling -> one 304-row step (4 padded rows) ---
    state_big = jax.random.normal(k_big, (300, state_dim), jnp.float32)
    out_big = jax.block_until_ready(actor_forward(state_big, params_f32, max_action))
    ref_big = actor_reference(state_big, params_f32, max_action)
    assert out_big.shape == (300, action_dim)
    assert jnp.allclose(out_big, ref_big, atol=1e-5, rtol=1e-5)

    # --- multi-step grid path (forced small tm_max): grid=(3,), tm=104 ---------
    out_multi = jax.block_until_ready(
        actor_forward(state_big, params_f32, max_action, tm_max=128))
    assert jnp.allclose(out_multi, ref_big, atol=1e-5, rtol=1e-5)

    # --- v7x-style two-step split (both TensorCores busy): grid=(2,), tm=152 ---
    out_2tc = jax.block_until_ready(
        actor_forward(state_big, params_f32, max_action, min_steps=2))
    assert jnp.allclose(out_2tc, ref_big, atol=1e-5, rtol=1e-5)

    # --- default bf16 weight path (half the weight HBM traffic, f32 accum) -----
    params_bf16 = init_actor_params(k_params, state_dim, action_dim)  # bf16 default
    out_bf16 = jax.block_until_ready(actor_forward(state_big, params_bf16, max_action))
    assert out_bf16.shape == (300, action_dim)
    assert jnp.all(jnp.isfinite(out_bf16))
    # bf16 matmuls vs f32 reference: relaxed tolerance.
    assert jnp.allclose(out_bf16, ref_big, atol=5e-2, rtol=5e-2)

    print("KERNEL_OK")
</pallas_src>

<mosaic_0001>
module attributes {stable_mosaic.version = 11 : i64} {
  func.func @_actor_kernel(%arg0: i32, %arg1: memref<8x8xf32, #tpu.memory_space<vmem>>, %arg2: memref<8x256xf32, #tpu.memory_space<vmem>>, %arg3: memref<1x256xf32, #tpu.memory_space<vmem>>, %arg4: memref<256x256xf32, #tpu.memory_space<vmem>>, %arg5: memref<1x256xf32, #tpu.memory_space<vmem>>, %arg6: memref<256x128xf32, #tpu.memory_space<vmem>>, %arg7: memref<1x128xf32, #tpu.memory_space<vmem>>, %arg8: memref<8x128xf32, #tpu.memory_space<vmem>>) attributes {dimension_semantics = [#tpu.dimension_semantics<parallel>], iteration_bounds = array<i64: 1>, scalar_prefetch = 0 : i64, scratch_operands = 0 : i64, tpu.core_type = #tpu.core_type<tc>, window_params = [{transform_indices = @transform_0, window_bounds = array<i64: 8, 8>}, {pipeline_mode = #tpu.pipeline_mode<synchronous>, transform_indices = @transform_1, window_bounds = array<i64: 8, 256>}, {pipeline_mode = #tpu.pipeline_mode<synchronous>, transform_indices = @transform_2, window_bounds = array<i64: 1, 256>}, {pipeline_mode = #tpu.pipeline_mode<synchronous>, transform_indices = @transform_3, window_bounds = array<i64: 256, 256>}, {pipeline_mode = #tpu.pipeline_mode<synchronous>, transform_indices = @transform_4, window_bounds = array<i64: 1, 256>}, {pipeline_mode = #tpu.pipeline_mode<synchronous>, transform_indices = @transform_5, window_bounds = array<i64: 256, 128>}, {pipeline_mode = #tpu.pipeline_mode<synchronous>, transform_indices = @transform_6, window_bounds = array<i64: 1, 128>}, {transform_indices = @transform_7, window_bounds = array<i64: 8, 128>}]} {
    %c0 = arith.constant 0 : index
    %c0_0 = arith.constant 0 : index
    %0 = vector.load %arg1[%c0, %c0_0] : memref<8x8xf32, #tpu.memory_space<vmem>>, vector<8x8xf32>
    %c0_1 = arith.constant 0 : index
    %c0_2 = arith.constant 0 : index
    %1 = vector.load %arg2[%c0_1, %c0_2] : memref<8x256xf32, #tpu.memory_space<vmem>>, vector<8x256xf32>
    %cst = arith.constant dense<0.000000e+00> : vector<8x256xf32>
    %2 = tpu.matmul %0, %1, %cst {dimension_numbers = #tpu.dot_dimension_numbers<[1], [0], [0], [1], [0, 0, 1, 1], [], []>} : vector<8x8xf32>, vector<8x256xf32>, vector<8x256xf32> -> vector<8x256xf32>
    %c0_3 = arith.constant 0 : index
    %c0_4 = arith.constant 0 : index
    %3 = vector.load %arg3[%c0_3, %c0_4] : memref<1x256xf32, #tpu.memory_space<vmem>>, vector<1x256xf32>
    %4 = vector.broadcast %3 : vector<1x256xf32> to vector<8x256xf32>
    %5 = arith.addf %2, %4 : vector<8x256xf32>
    %cst_5 = arith.constant 0.000000e+00 : f32
    %6 = vector.broadcast %cst_5 : f32 to vector<8x256xf32>
    %7 = arith.maximumf %5, %6 : vector<8x256xf32>
    %c0_6 = arith.constant 0 : index
    %c0_7 = arith.constant 0 : index
    %8 = vector.load %arg4[%c0_6, %c0_7] : memref<256x256xf32, #tpu.memory_space<vmem>>, vector<256x256xf32>
    %cst_8 = arith.constant dense<0.000000e+00> : vector<8x256xf32>
    %9 = tpu.matmul %7, %8, %cst_8 {dimension_numbers = #tpu.dot_dimension_numbers<[1], [0], [0], [1], [0, 0, 1, 1], [], []>} : vector<8x256xf32>, vector<256x256xf32>, vector<8x256xf32> -> vector<8x256xf32>
    %c0_9 = arith.constant 0 : index
    %c0_10 = arith.constant 0 : index
    %10 = vector.load %arg5[%c0_9, %c0_10] : memref<1x256xf32, #tpu.memory_space<vmem>>, vector<1x256xf32>
    %11 = vector.broadcast %10 : vector<1x256xf32> to vector<8x256xf32>
    %12 = arith.addf %9, %11 : vector<8x256xf32>
    %cst_11 = arith.constant 0.000000e+00 : f32
    %13 = vector.broadcast %cst_11 : f32 to vector<8x256xf32>
    %14 = arith.maximumf %12, %13 : vector<8x256xf32>
    %c0_12 = arith.constant 0 : index
    %c0_13 = arith.constant 0 : index
    %15 = vector.load %arg6[%c0_12, %c0_13] : memref<256x128xf32, #tpu.memory_space<vmem>>, vector<256x128xf32>
    %cst_14 = arith.constant dense<0.000000e+00> : vector<8x128xf32>
    %16 = tpu.matmul %14, %15, %cst_14 {dimension_numbers = #tpu.dot_dimension_numbers<[1], [0], [0], [1], [0, 0, 1, 1], [], []>} : vector<8x256xf32>, vector<256x128xf32>, vector<8x128xf32> -> vector<8x128xf32>
    %c0_15 = arith.constant 0 : index
    %c0_16 = arith.constant 0 : index
    %17 = vector.load %arg7[%c0_15, %c0_16] : memref<1x128xf32, #tpu.memory_space<vmem>>, vector<1x128xf32>
    %18 = vector.broadcast %17 : vector<1x128xf32> to vector<8x128xf32>
    %19 = arith.addf %16, %18 : vector<8x128xf32>
    %20 = math.tanh %19 : vector<8x128xf32>
    %cst_17 = arith.constant 2.000000e+00 : f32
    %21 = vector.broadcast %cst_17 : f32 to vector<8x128xf32>
    %22 = arith.mulf %21, %20 : vector<8x128xf32>
    %c0_18 = arith.constant 0 : index
    %c0_19 = arith.constant 0 : index
    %23 = vector.load %arg8[%c0_18, %c0_19] : memref<8x128xf32, #tpu.memory_space<vmem>>, vector<8x128xf32>
    tpu.vector_store %arg8[%c0_18, %c0_19], %22 {strides = array<i32>} : memref<8x128xf32, #tpu.memory_space<vmem>>, vector<8x128xf32>,
    return
  }
  func.func @transform_0(%arg0: i32) -> (i32, i32) {
    %c0_i32 = arith.constant 0 : i32
    %c0_i32_0 = arith.constant 0 : i32
    return %arg0, %c0_i32 : i32, i32
  }
  func.func @transform_1(%arg0: i32) -> (i32, i32) {
    %c0_i32 = arith.constant 0 : i32
    %c0_i32_0 = arith.constant 0 : i32
    %c0_i32_1 = arith.constant 0 : i32
    return %c0_i32, %c0_i32_0 : i32, i32
  }
  func.func @transform_2(%arg0: i32) -> (i32, i32) {
    %c0_i32 = arith.constant 0 : i32
    %c0_i32_0 = arith.constant 0 : i32
    %c0_i32_1 = arith.constant 0 : i32
    return %c0_i32, %c0_i32_0 : i32, i32
  }
  func.func @transform_3(%arg0: i32) -> (i32, i32) {
    %c0_i32 = arith.constant 0 : i32
    %c0_i32_0 = arith.constant 0 : i32
    %c0_i32_1 = arith.constant 0 : i32
    return %c0_i32, %c0_i32_0 : i32, i32
  }
  func.func @transform_4(%arg0: i32) -> (i32, i32) {
    %c0_i32 = arith.constant 0 : i32
    %c0_i32_0 = arith.constant 0 : i32
    %c0_i32_1 = arith.constant 0 : i32
    return %c0_i32, %c0_i32_0 : i32, i32
  }
  func.func @transform_5(%arg0: i32) -> (i32, i32) {
    %c0_i32 = arith.constant 0 : i32
    %c0_i32_0 = arith.constant 0 : i32
    %c0_i32_1 = arith.constant 0 : i32
    return %c0_i32, %c0_i32_0 : i32, i32
  }
  func.func @transform_6(%arg0: i32) -> (i32, i32) {
    %c0_i32 = arith.constant 0 : i32
    %c0_i32_0 = arith.constant 0 : i32
    %c0_i32_1 = arith.constant 0 : i32
    return %c0_i32, %c0_i32_0 : i32, i32
  }
  func.func @transform_7(%arg0: i32) -> (i32, i32) {
    %c0_i32 = arith.constant 0 : i32
    %c0_i32_0 = arith.constant 0 : i32
    return %arg0, %c0_i32 : i32, i32
  }
}

</mosaic_0001>

<bundles_post_ra>
// kernel: tpu_custom_call.1
= control target key start
LH: loop header
LB: loop body
LE: loop exit
PB: predicated region body
PF: predicated region fallthrough
CT: control target
= control target key end

     0   :  { %12 = vsyncpa [#allocation3], 0  ;;  %s645_s0 = inlined_call_operand.hbm [shape: f32[8,8], index: 0, kind: input, shape index: {}]   ;;  %s646_s1 = inlined_call_operand.hbm [shape: f32[8,256], index: 1, kind: input, shape index: {}]   ;;  %s647_s2 = inlined_call_operand.hbm [shape: f32[1,256], index: 2, kind: input, shape index: {}]   ;;  %s648_s3 = inlined_call_operand.hbm [shape: f32[256,256], index: 3, kind: input, shape index: {}]   ;;  %s649_s4 = inlined_call_operand.vmem [shape: f32[1,256], index: 4, kind: input, shape index: {}]   ;;  %s650_s5 = inlined_call_operand.hbm [shape: f32[256,128], index: 5, kind: input, shape index: {}]   ;;  %s651_s6 = inlined_call_operand.vmem [shape: f32[1,128], index: 6, kind: input, shape index: {}]   ;;  %s652_s7 = inlined_call_operand.hbm [shape: f32[8,128], index: 7, kind: output, shape index: {}]  }
   0x1   :  { %13 = vsyncpa [#allocation6], 0 }
   0x2   :  { %14 = vsyncpa [#allocation9], 0  ;;  %s32_s26 = sshll.u32 %s646_s1, 4  ;;  %s33_s26 = int_to_ptr.hbm [resolvable:$true] %s32_s26 }
   0x3   :  { %15 = vsyncpa [#allocation4], 0  ;;  %s571_s27 = smov [#allocation5]   ;;  %s53_s8 = sshll.u32 %s648_s3, 4  ;;  %s54_s8 = int_to_ptr.hbm [resolvable:$true] %s53_s8 }
   0x4   :  { %s34_s28 = sshll.u32 %s571_s27, 4  ;;  %s572_s9 = smov [#allocation8]   ;;  %s35_s28 = int_to_ptr.vmem [resolvable:$true] %s34_s28 }
   0x5   :  { %37 = dma.hbm_to_vmem [thread:$0]  %s33_s26, 256, %s35_s28, [#allocation6]  }
   0x6   :  { %s55_s10 = sshll.u32 %s572_s9, 4  ;;  %s573_s11 = smov 256   ;;  %s56_s10 = int_to_ptr.vmem [resolvable:$true] %s55_s10 }
   0x7   :  { %s574_s12 = smov 16   ;;  %s21_s1 = sshll.u32 %s645_s0, 4  ;;  %s22_s1 = int_to_ptr.hbm [resolvable:$true] %s21_s1 }
   0x8   :  { %61 = dma.hbm_to_vmem [thread:$0]  %s54_s8, 8192, %s56_s10, [#allocation9], %s573_s11, %s573_s11, %s574_s12  }
   0x9   :  { %s575_s15 = smov [#allocation2]   ;;  %s43_s3 = sshll.u32 %s647_s2, 4  ;;  %s44_s3 = int_to_ptr.hbm [resolvable:$true] %s43_s3 }
   0xa   :  { %s23_s16 = sshll.u32 %s575_s15, 4  ;;  %s576_s19 = smov [#allocation7]   ;;  %s24_s16 = int_to_ptr.vmem [resolvable:$true] %s23_s16 }
   0xb   :  { %26 = dma.hbm_to_vmem [thread:$0]  %s22_s1, 128, %s24_s16, [#allocation3]  }
   0xc   :  { %s45_s20 = sshll.u32 %s576_s19, 4  ;;  %s68_s23 = sshll.u32 %s650_s5, 4  ;;  %s46_s20 = int_to_ptr.vmem [resolvable:$true] %s45_s20  ;;  %s69_s23 = int_to_ptr.hbm [resolvable:$true] %s68_s23 }
   0xd   :  { %48 = dma.hbm_to_vmem [thread:$0]  %s44_s3, 32, %s46_s20, [#allocation6]  }
   0xe   :  { %s577_s0 = smov [#allocation10]   ;;  %s578_s25 = smov 128  }
   0xf   :  { %s70_s24 = sshll.u32 %s577_s0, 4  ;;  %s579_s26 = smov 8   ;;  %s71_s24 = int_to_ptr.vmem [resolvable:$true] %s70_s24 }
  0x10   :  { %76 = dma.hbm_to_vmem [thread:$0]  %s69_s23, 4096, %s71_s24, [#allocation9], %s578_s25, %s578_s25, %s579_s26  }
  0x11   :  { %563 = dma.done.wait [#allocation3], 128  }
  0x12   :  { %564 = vsyncadd [#allocation3], 4294967168 }
  0x13   :  { %565 = dma.done.wait [#allocation6], 288  }
  0x14   :  { %566 = vsyncadd [#allocation6], 4294967008 }
  0x15   :  { %567 = dma.done.wait [#allocation9], 12288  }
  0x16   :  { %568 = vsyncadd [#allocation9], 4294955008  ;;  %vm108_vm0 = vcmask 64512   ;;  %v100_v0 = vld [vmem:[#allocation5] sm:$0xff]  ;;  %v99_v1 = vld [vmem:[#allocation2] sm:$0xff]  ;;  %s392_s9 = sshll.u32 %s652_s7, 4  ;;  %s393_s9 = int_to_ptr.hbm [resolvable:$true] %s392_s9 }
  0x17   :  { %v101_v2 = vld [vmem:[#allocation5 + $0x8] sm:$0xff]  ;;  %127 = vmatpush.msra.mxu0 %v100_v0  ;;  %v182_v5 = vld [vmem:[#allocation8 + $0xe0] sm:$0xff]  ;;  %v183_v7 = vld [vmem:[#allocation8 + $0xe8] sm:$0xff] }
  0x18   :  { %147 = vmatpush.msra.mxu1 %v101_v2  ;;  %v184_v3 = vld [vmem:[#allocation8 + $0xf0] sm:$0xff]  ;;  %v185_v4 = vld [vmem:[#allocation8 + $0xf8] sm:$0xff]  ;;  %404 = vmatmul.msk.f32.vlgmr.msra.gmra.mxu0 %vm108_vm0, %v99_v1  ;;  %v214_v9 = vld [vmem:[#allocation8 + $0x1e0] sm:$0xff] }
  0x19   :  { %405 = vmatmul.msk.f32.vlgmr.msra.gmra.mxu1 %vm108_vm0, %v99_v1  ;;  %v216_v6 = vld [vmem:[#allocation8 + $0x1f0] sm:$0xff]  ;;  %v217_v8 = vld [vmem:[#allocation8 + $0x1f8] sm:$0xff]  ;;  %224 = vmatpush.msra.mxu2 %v184_v3  ;;  %v215_v12 = vld [vmem:[#allocation8 + $0x1e8] sm:$0xff] }
  0x1a   :  { %264 = vmatpush.msrb.mxu0 %v185_v4  ;;  %244 = vmatpush.msra.mxu3 %v216_v6  ;;  %v180_v10 = vld [vmem:[#allocation8 + $0xd0] sm:$0xff]  ;;  %v181_v11 = vld [vmem:[#allocation8 + $0xd8] sm:$0xff]  ;;  %v178_v15 = vld [vmem:[#allocation8 + $0xc0] sm:$0xff] }
  0x1b   :  { %284 = vmatpush.msrb.mxu1 %v217_v8  ;;  %225 = vmatpush.msra.mxu2 %v182_v5  ;;  %v212_v13 = vld [vmem:[#allocation8 + $0x1d0] sm:$0xff]  ;;  %v213_v14 = vld [vmem:[#allocation8 + $0x1d8] sm:$0xff]  ;;  %v179_v16 = vld [vmem:[#allocation8 + $0xc8] sm:$0xff] }
  0x1c   :  { %265 = vmatpush.msrb.mxu0 %v183_v7  ;;  %245 = vmatpush.msra.mxu3 %v214_v9  ;;  %v210_v17 = vld [vmem:[#allocation8 + $0x1c0] sm:$0xff]  ;;  %v211_v18 = vld [vmem:[#allocation8 + $0x1c8] sm:$0xff]  ;;  %v176_v19 = vld [vmem:[#allocation8 + $0xb0] sm:$0xff] }
  0x1d   :  { %285 = vmatpush.msrb.mxu1 %v215_v12  ;;  %226 = vmatpush.msra.mxu2 %v180_v10  ;;  %v177_v20 = vld [vmem:[#allocation8 + $0xb8] sm:$0xff]  ;;  %v208_v21 = vld [vmem:[#allocation8 + $0x1b0] sm:$0xff]  ;;  %v174_v23 = vld [vmem:[#allocation8 + $0xa0] sm:$0xff] }
  0x1e   :  { %266 = vmatpush.msrb.mxu0 %v181_v11  ;;  %246 = vmatpush.msra.mxu3 %v212_v13  ;;  %v209_v22 = vld [vmem:[#allocation8 + $0x1b8] sm:$0xff]  ;;  %v175_v24 = vld [vmem:[#allocation8 + $0xa8] sm:$0xff]  ;;  %v206_v25 = vld [vmem:[#allocation8 + $0x1a0] sm:$0xff] }
  0x1f   :  { %286 = vmatpush.msrb.mxu1 %v213_v14  ;;  %227 = vmatpush.msra.mxu2 %v178_v15  ;;  %v207_v26 = vld [vmem:[#allocation8 + $0x1a8] sm:$0xff]  ;;  %v172_v27 = vld [vmem:[#allocation8 + $0x90] sm:$0xff]  ;;  %v173_v28 = vld [vmem:[#allocation8 + $0x98] sm:$0xff] }
  0x20   :  { %267 = vmatpush.msrb.mxu0 %v179_v16  ;;  %247 = vmatpush.msra.mxu3 %v210_v17  ;;  %v204_v29 = vld [vmem:[#allocation8 + $0x190] sm:$0xff]  ;;  %v205_v30 = vld [vmem:[#allocation8 + $0x198] sm:$0xff]  ;;  %v170_v31 = vld [vmem:[#allocation8 + $0x80] sm:$0xff] }
  0x21   :  { %287 = vmatpush.msrb.mxu1 %v211_v18  ;;  %228 = vmatpush.msra.mxu2 %v176_v19  ;;  %v171_v32 = vld [vmem:[#allocation8 + $0x88] sm:$0xff]  ;;  %v202_v33 = vld [vmem:[#allocation8 + $0x180] sm:$0xff]  ;;  %v168_v35 = vld [vmem:[#allocation8 + $0x70] sm:$0xff] }
  0x22   :  { %268 = vmatpush.msrb.mxu0 %v177_v20  ;;  %248 = vmatpush.msra.mxu3 %v208_v21  ;;  %v203_v34 = vld [vmem:[#allocation8 + $0x188] sm:$0xff]  ;;  %v169_v36 = vld [vmem:[#allocation8 + $0x78] sm:$0xff]  ;;  %v200_v37 = vld [vmem:[#allocation8 + $0x170] sm:$0xff] }
  0x23   :  { %288 = vmatpush.msrb.mxu1 %v209_v22  ;;  %229 = vmatpush.msra.mxu2 %v174_v23  ;;  %v201_v38 = vld [vmem:[#allocation8 + $0x178] sm:$0xff]  ;;  %v166_v39 = vld [vmem:[#allocation8 + $0x60] sm:$0xff]  ;;  %v167_v40 = vld [vmem:[#allocation8 + $0x68] sm:$0xff] }
  0x24   :  { %269 = vmatpush.msrb.mxu0 %v175_v24  ;;  %249 = vmatpush.msra.mxu3 %v206_v25  ;;  %v198_v41 = vld [vmem:[#allocation8 + $0x160] sm:$0xff]  ;;  %v199_v42 = vld [vmem:[#allocation8 + $0x168] sm:$0xff]  ;;  %v164_v43 = vld [vmem:[#allocation8 + $0x50] sm:$0xff] }
  0x25   :  { %289 = vmatpush.msrb.mxu1 %v207_v26  ;;  %230 = vmatpush.msra.mxu2 %v172_v27  ;;  %v165_v44 = vld [vmem:[#allocation8 + $0x58] sm:$0xff]  ;;  %v196_v45 = vld [vmem:[#allocation8 + $0x150] sm:$0xff]  ;;  %v162_v47 = vld [vmem:[#allocation8 + $0x40] sm:$0xff] }
  0x26   :  { %270 = vmatpush.msrb.mxu0 %v173_v28  ;;  %250 = vmatpush.msra.mxu3 %v204_v29  ;;  %v197_v46 = vld [vmem:[#allocation8 + $0x158] sm:$0xff]  ;;  %v163_v48 = vld [vmem:[#allocation8 + $0x48] sm:$0xff]  ;;  %v194_v49 = vld [vmem:[#allocation8 + $0x140] sm:$0xff] }
  0x27   :  { %290 = vmatpush.msrb.mxu1 %v205_v30  ;;  %231 = vmatpush.msra.mxu2 %v170_v31  ;;  %v195_v50 = vld [vmem:[#allocation8 + $0x148] sm:$0xff]  ;;  %v160_v51 = vld [vmem:[#allocation8 + $0x30] sm:$0xff]  ;;  %v161_v52 = vld [vmem:[#allocation8 + $0x38] sm:$0xff] }
  0x28   :  { %271 = vmatpush.msrb.mxu0 %v171_v32  ;;  %251 = vmatpush.msra.mxu3 %v202_v33  ;;  %v158_v53 = vld [vmem:[#allocation8 + $0x20] sm:$0xff]  ;;  %v192_v54 = vld [vmem:[#allocation8 + $0x130] sm:$0xff]  ;;  %v159_v55 = vld [vmem:[#allocation8 + $0x28] sm:$0xff] }
  0x29   :  { %291 = vmatpush.msrb.mxu1 %v203_v34  ;;  %232 = vmatpush.msra.mxu2 %v168_v35  ;;  %v193_v56 = vld [vmem:[#allocation8 + $0x138] sm:$0xff]  ;;  %v156_v57 = vld [vmem:[#allocation8 + $0x10] sm:$0xff]  ;;  %v190_v58 = vld [vmem:[#allocation8 + $0x120] sm:$0xff] }
  0x2a   :  { %272 = vmatpush.msrb.mxu0 %v169_v36  ;;  %252 = vmatpush.msra.mxu3 %v200_v37  ;;  %v157_v59 = vld [vmem:[#allocation8 + $0x18] sm:$0xff]  ;;  %v191_v60 = vld [vmem:[#allocation8 + $0x128] sm:$0xff]  ;;  %v154_v61 = vld [vmem:[#allocation8] sm:$0xff] }
  0x2b   :  { %292 = vmatpush.msrb.mxu1 %v201_v38  ;;  %233 = vmatpush.msra.mxu2 %v166_v39  ;;  %v188_v62 = vld [vmem:[#allocation8 + $0x110] sm:$0xff]  ;;  %v155_v63 = vld [vmem:[#allocation8 + $0x8] sm:$0xff]  ;;  %v189_v0 = vld [vmem:[#allocation8 + $0x118] sm:$0xff] }
  0x2c   :  { %273 = vmatpush.msrb.mxu0 %v167_v40  ;;  %253 = vmatpush.msra.mxu3 %v198_v41  ;;  %v186_v1 = vld [vmem:[#allocation8 + $0x100] sm:$0xff]  ;;  %v187_v2 = vld [vmem:[#allocation8 + $0x108] sm:$0xff]  ;;  %v337_v3 = vld [vmem:[#allocation10 + $0xf8] sm:$0xff] }
  0x2d   :  { %293 = vmatpush.msrb.mxu1 %v199_v42  ;;  %234 = vmatpush.msra.mxu2 %v164_v43  ;;  %v336_v4 = vld [vmem:[#allocation10 + $0xf0] sm:$0xff]  ;;  %v321_v5 = vld [vmem:[#allocation10 + $0x78] sm:$0xff]  ;;  %v335_v7 = vld [vmem:[#allocation10 + $0xe8] sm:$0xff] }
  0x2e   :  { %274 = vmatpush.msrb.mxu0 %v165_v44  ;;  %254 = vmatpush.msra.mxu3 %v196_v45  ;;  %v320_v6 = vld [vmem:[#allocation10 + $0x70] sm:$0xff]  ;;  %v319_v8 = vld [vmem:[#allocation10 + $0x68] sm:$0xff]  ;;  %v334_v9 = vld [vmem:[#allocation10 + $0xe0] sm:$0xff] }
  0x2f   :  { %294 = vmatpush.msrb.mxu1 %v197_v46  ;;  %235 = vmatpush.msra.mxu2 %v162_v47  ;;  %v318_v10 = vld [vmem:[#allocation10 + $0x60] sm:$0xff]  ;;  %v333_v11 = vld [vmem:[#allocation10 + $0xd8] sm:$0xff]  ;;  %v332_v13 = vld [vmem:[#allocation10 + $0xd0] sm:$0xff] }
  0x30   :  { %275 = vmatpush.msrb.mxu0 %v163_v48  ;;  %255 = vmatpush.msra.mxu3 %v194_v49  ;;  %v317_v12 = vld [vmem:[#allocation10 + $0x58] sm:$0xff]  ;;  %v316_v14 = vld [vmem:[#allocation10 + $0x50] sm:$0xff]  ;;  %v331_v15 = vld [vmem:[#allocation10 + $0xc8] sm:$0xff] }
  0x31   :  { %295 = vmatpush.msrb.mxu1 %v195_v50  ;;  %236 = vmatpush.msra.mxu2 %v160_v51  ;;  %v315_v16 = vld [vmem:[#allocation10 + $0x48] sm:$0xff]  ;;  %v330_v17 = vld [vmem:[#allocation10 + $0xc0] sm:$0xff]  ;;  %v329_v19 = vld [vmem:[#allocation10 + $0xb8] sm:$0xff] }
  0x32   :  { %276 = vmatpush.msrb.mxu0 %v161_v52  ;;  %256 = vmatpush.msra.mxu3 %v192_v54  ;;  %v314_v18 = vld [vmem:[#allocation10 + $0x40] sm:$0xff]  ;;  %v313_v20 = vld [vmem:[#allocation10 + $0x38] sm:$0xff]  ;;  %v328_v21 = vld [vmem:[#allocation10 + $0xb0] sm:$0xff] }
  0x33   :  { %237 = vmatpush.msra.mxu2 %v158_v53  ;;  %296 = vmatpush.msrb.mxu1 %v193_v56  ;;  %v327_v22 = vld [vmem:[#allocation10 + $0xa8] sm:$0xff]  ;;  %v102_v23 = vld [vmem:[#allocation7] sm:$0x3]  ;;  %v326_v24 = vld [vmem:[#allocation10 + $0xa0] sm:$0xff] }
  0x34   :  { %277 = vmatpush.msrb.mxu0 %v159_v55  ;;  %257 = vmatpush.msra.mxu3 %v190_v58  ;;  %v104_v25 = vperm.slane %v102_v23, 0  ;;  %v105_v26 = vperm.slane %v102_v23, 1  ;;  %v312_v33 = vld [vmem:[#allocation10 + $0x30] sm:$0xff]  ;;  %v325_v34 = vld [vmem:[#allocation10 + $0x98] sm:$0xff]  ;;  %v311_v35 = vld [vmem:[#allocation10 + $0x28] sm:$0xff] }
  0x35   :  { %238 = vmatpush.msra.mxu2 %v156_v57  ;;  %297 = vmatpush.msrb.mxu1 %v191_v60  ;;  %v324_v36 = vld [vmem:[#allocation10 + $0x90] sm:$0xff]  ;;  %v310_v37 = vld [vmem:[#allocation10 + $0x20] sm:$0xff]  ;;  %v323_v38 = vld [vmem:[#allocation10 + $0x88] sm:$0xff] }
  0x36   :  { %278 = vmatpush.msrb.mxu0 %v157_v59  ;;  %258 = vmatpush.msra.mxu3 %v188_v62  ;;  %v309_v39 = vld [vmem:[#allocation10 + $0x18] sm:$0xff]  ;;  %v322_v40 = vld [vmem:[#allocation10 + $0x80] sm:$0xff]  ;;  %v308_v41 = vld [vmem:[#allocation10 + $0x10] sm:$0xff] }
  0x37   :  { %239 = vmatpush.msra.mxu2 %v154_v61  ;;  %298 = vmatpush.msrb.mxu1 %v189_v0  ;;  %v307_v42 = vld [vmem:[#allocation10 + $0x8] sm:$0xff]  ;;  %v306_v43 = vld [vmem:[#allocation10] sm:$0xff] }
  0x38   :  { %279 = vmatpush.msrb.mxu0 %v155_v63  ;;  %259 = vmatpush.msra.mxu3 %v186_v1  ;;  %v218_v44 = vld [vmem:[%s649_s4] sm:$0x3]  ;;  %s580_s4 = smov [#allocation11]  }
  0x39   :  { %299 = vmatpush.msrb.mxu1 %v187_v2  ;;  %342 = vmatpush.msrb.mxu2 %v321_v5  ;;  %v221_v45 = vperm.slane %v218_v44, 1  ;;  %v220_v50 = vperm.slane %v218_v44, 0  ;;  %v416_v57 = vld [vmem:[%s651_s6] ss:$0 sm:$0xff]  ;;  %s390_s29 = sshll.u32 %s580_s4, 4  ;;  %s391_s29 = int_to_ptr.vmem [resolvable:$true] %s390_s29 }
  0x3a   :  { %362 = vmatpush.msrb.mxu3 %v337_v3 }
  0x3b   :  { %343 = vmatpush.msrb.mxu2 %v320_v6 }
  0x3c   :  { %363 = vmatpush.msrb.mxu3 %v336_v4 }
  0x3d   :  { %344 = vmatpush.msrb.mxu2 %v319_v8 }
  0x3e   :  { %364 = vmatpush.msrb.mxu3 %v335_v7 }
  0x3f   :  { %345 = vmatpush.msrb.mxu2 %v318_v10 }
  0x40   :  { %365 = vmatpush.msrb.mxu3 %v334_v9 }
  0x41   :  { %346 = vmatpush.msrb.mxu2 %v317_v12 }
  0x42   :  { %366 = vmatpush.msrb.mxu3 %v333_v11 }
  0x43   :  { %347 = vmatpush.msrb.mxu2 %v316_v14 }
  0x44   :  { %367 = vmatpush.msrb.mxu3 %v332_v13 }
  0x45   :  { %348 = vmatpush.msrb.mxu2 %v315_v16 }
  0x46   :  { %368 = vmatpush.msrb.mxu3 %v331_v15 }
  0x47   :  { %349 = vmatpush.msrb.mxu2 %v314_v18 }
  0x48   :  { %369 = vmatpush.msrb.mxu3 %v330_v17 }
  0x49   :  { %350 = vmatpush.msrb.mxu2 %v313_v20 }
  0x4a   :  { %370 = vmatpush.msrb.mxu3 %v329_v19 }
  0x4b   :  { %351 = vmatpush.msrb.mxu2 %v312_v33 }
  0x4c   :  { %371 = vmatpush.msrb.mxu3 %v328_v21 }
  0x4d   :  { %352 = vmatpush.msrb.mxu2 %v311_v35 }
  0x4e   :  { %372 = vmatpush.msrb.mxu3 %v327_v22 }
  0x4f   :  { %353 = vmatpush.msrb.mxu2 %v310_v37 }
  0x50   :  { %373 = vmatpush.msrb.mxu3 %v326_v24 }
  0x51   :  { %354 = vmatpush.msrb.mxu2 %v309_v39 }
  0x52   :  { %374 = vmatpush.msrb.mxu3 %v325_v34 }
  0x53   :  { %355 = vmatpush.msrb.mxu2 %v308_v41 }
  0x54   :  { %375 = vmatpush.msrb.mxu3 %v324_v36 }
  0x55   :  { %356 = vmatpush.msrb.mxu2 %v307_v42 }
  0x56   :  { %376 = vmatpush.msrb.mxu3 %v323_v38 }
  0x57   :  { %357 = vmatpush.msrb.mxu2 %v306_v43 }
  0x58   :  { %377 = vmatpush.msrb.mxu3 %v322_v40 }
  0x95   :  { %v129_v27 = vpop.f32.mrf.mxu0 }
  0x96   :  { %v149_v28 = vpop.f32.mrf.mxu1  ;;  %v130_v29 = vadd.f32 %v129_v27, %v104_v25 }
  0x97   :  { %v150_v30 = vadd.f32 %v149_v28, %v105_v26 }
  0x98   :  { %v152_v31 = vmax.f32 %v130_v29, 0.0 }
  0x99   :  { %v153_v32 = vmax.f32 %v150_v30, 0.0 }
  0x9a   :  { %240 = vmatmul.f32.vlgmr.msra.gmra.mxu2 %v152_v31  ;;  %280 = vmatmul.f32.vlgmr.msrb.gmra.mxu0 %v152_v31 }
  0x9b   :  { %260 = vmatmul.f32.vlgmr.msra.gmra.mxu3 %v153_v32  ;;  %300 = vmatmul.f32.vlgmr.msrb.gmra.mxu1 %v153_v32 }
 0x117   :  { %v281_v46 = vpop.f32.mrf.mxu0 }
 0x118   :  { %v282_v47 = vadd.f32 %v281_v46, %v221_v45  ;;  %v301_v48 = vpop.f32.mrf.mxu1 }
 0x11a   :  { %v302_v49 = vadd.f32 %v301_v48, %v282_v47 }
 0x11c   :  { %v305_v51 = vmax.f32 %v302_v49, 0.0 }
 0x11d   :  { %v241_v52 = vpop.f32.mrf.mxu2 }
 0x11e   :  { %v242_v53 = vadd.f32 %v241_v52, %v220_v50  ;;  %378 = vmatmul.f32.vlgmr.msrb.gmra.mxu3 %v305_v51  ;;  %v261_v54 = vpop.f32.mrf.mxu3 }
 0x120   :  { %v262_v55 = vadd.f32 %v261_v54, %v242_v53 }
 0x122   :  { %v304_v56 = vmax.f32 %v262_v55, 0.0 }
 0x124   :  { %358 = vmatmul.f32.vlgmr.msrb.gmra.mxu2 %v304_v56 }
 0x1a1   :  { %v379_v60 = vpop.f32.mrf.mxu3 }
 0x1a7   :  { %v359_v58 = vpop.f32.mrf.mxu2 }
 0x1a8   :  { %v360_v59 = vadd.f32 %v416_v57, %v359_v58 }
 0x1aa   :  { %v380_v61 = vadd.f32 %v379_v60, %v360_v59 }
 0x1ac   :  { %417 = vtanh.f32 %v380_v61 }
 0x1b2   :  { %v418_v62 = vpop.eup %417 }
 0x1b3   :  { %v383_v63 = vmul.f32 2.0, %v418_v62 }
 0x1b5   :  { %384 = vst [vmem:[#allocation11] sm:$0xff] %v383_v63 }
 0x1b6   :  { %395 = dma.vmem_to_hbm [thread:$0]  %s391_s29, 128, %s393_s9, [#allocation4]  }
 0x1b7   :  { %569 = dma.done.wait [#allocation4], 128  }
 0x1b8   :  { %570 = vsyncadd [#allocation4], 4294967168 }
 0x1b9   :  { %400 = vsyncpa [#allocation3], 1 }
 0x1ba   :  { %401 = vsyncpa [#allocation6], 1 }
 0x1bb   :  { %402 = vsyncpa [#allocation9], 1 }
 0x1bc   :  { %403 = vsyncpa [#allocation4], 1 }

</bundles_post_ra>
